<compile_context>
chip_gen: v7x
topology: tpu7x:2x2x1
jax: 0.10.0
libtpu: 0.0.40
codegen_flags: <defaults>
</compile_context>

<pallas_src>
import functools

import jax
import jax.numpy as jnp
from jax import lax
from jax.experimental import pallas as pl
from jax.experimental.pallas import tpu as pltpu


def _batch_select_kernel(pts_ref, xyz_ref, cnt_ref, *, n_total, tn):
    # pts_ref: (4, tn)        channel-first slab of point_bxyz for lane-tile n
    # xyz_ref: (1, 3, tn)     output block for (batch b, tile n)
    # cnt_ref: (1, 1, 8, 128) per-(batch, tile) partial count block
    b = pl.program_id(0)
    n = pl.program_id(1)

    pts = pts_ref[...]                                        # (4, tn) f32

    # Mask out remainder-tile padding lanes (when N % tn != 0).
    lane = lax.broadcasted_iota(jnp.int32, (1, tn), 1) + n * tn
    valid = lane < n_total                                    # (1, tn) bool

    # point_bxyz[:, 0] == b  -- compared as int32 (robust batch-id match).
    bid = pts[0:1, :].astype(jnp.int32)                       # (1, tn)
    mask = jnp.logical_and(bid == b, valid)                   # (1, tn)

    # point_xyz = point_bxyz[mask, 1:4]  (dense, zero-padded encoding).
    xyz = pts[1:4, :]                                         # (3, tn)
    xyz_ref[0] = xyz * mask.astype(xyz.dtype)

    # Partial count of points belonging to batch b in this tile.
    cnt = jnp.sum(mask.astype(jnp.int32))
    cnt_ref[...] = jnp.full((1, 1, 8, 128), cnt, dtype=jnp.int32)


def plotly_visualizer_points(point_bxyz_cf, batch_size, *, tile_n=2048):
    """Pallas equivalent of the per-batch point selection in forward().

    Args:
      point_bxyz_cf: (4, N) float32, channel-first rows = (batch_idx, x, y, z).
      batch_size: int, number of batches B.
      tile_n: lane-tile size along N (multiple of 128).

    Returns:
      masked_xyz: (B, 3, N) float32 -- xyz of points in batch b (channel-first),
                  zeros for points not in batch b (NOT compacted; use counts).
      counts:     (B,) int32        -- number of points belonging to batch b.
    """
    c, n_total = point_bxyz_cf.shape
    assert c == 4, "expected channel-first (4, N) point_bxyz"
    b_total = int(batch_size)

    # Tile size: multiple of 128, no larger than N rounded up to a lane multiple.
    tn = max(128, min(int(tile_n), ((n_total + 127) // 128) * 128))
    num_tiles = pl.cdiv(n_total, tn)

    kernel = functools.partial(_batch_select_kernel, n_total=n_total, tn=tn)

    xyz_out, cnt_out = pl.pallas_call(
        kernel,
        out_shape=(
            jax.ShapeDtypeStruct((b_total, 3, n_total), jnp.float32),
            jax.ShapeDtypeStruct((b_total, num_tiles, 8, 128), jnp.int32),
        ),
        grid=(b_total, num_tiles),
        in_specs=[
            pl.BlockSpec((4, tn), lambda b, n: (0, n)),
        ],
        out_specs=(
            pl.BlockSpec((1, 3, tn), lambda b, n: (b, 0, n)),
            pl.BlockSpec((1, 1, 8, 128), lambda b, n: (b, n, 0, 0)),
        ),
        compiler_params=pltpu.CompilerParams(
            dimension_semantics=("parallel", "parallel")),
    )(jnp.asarray(point_bxyz_cf, jnp.float32))

    counts = jnp.sum(cnt_out[:, :, 0, 0], axis=1)             # (B,) int32
    return xyz_out, counts


if __name__ == "__main__":
    key = jax.random.PRNGKey(0)
    B = 2
    N = 384          # deliberately NOT a multiple of the tile -> remainder path
    TN = 256

    k_xyz, k_bid = jax.random.split(key)
    xyz = jax.random.uniform(k_xyz, (3, N), jnp.float32, minval=-50.0, maxval=50.0)
    bid = jax.random.randint(k_bid, (1, N), 0, B).astype(jnp.float32)
    point_bxyz_cf = jnp.concatenate([bid, xyz], axis=0)        # (4, N) channel-first

    masked_xyz, counts = plotly_visualizer_points(point_bxyz_cf, B, tile_n=TN)
    masked_xyz = jax.block_until_ready(masked_xyz)
    counts = jax.block_until_ready(counts)

    # Pure-JAX reference of the same masking semantics.
    bid_i = point_bxyz_cf[0].astype(jnp.int32)                             # (N,)
    ref_mask = bid_i[None, :] == jnp.arange(B, dtype=jnp.int32)[:, None]   # (B, N)
    ref_xyz = jnp.where(ref_mask[:, None, :], point_bxyz_cf[None, 1:4, :], 0.0)
    ref_cnt = jnp.sum(ref_mask, axis=1).astype(jnp.int32)

    assert jnp.allclose(masked_xyz, ref_xyz), "xyz mismatch"
    assert jnp.array_equal(counts, ref_cnt), "count mismatch"

    print("KERNEL_OK")
</pallas_src>

<mosaic_0001>
module attributes {stable_mosaic.version = 11 : i64} {
  func.func @_batch_select_kernel(%arg0: i32, %arg1: i32, %arg2: memref<4x256xf32, #tpu.memory_space<vmem>>, %arg3: memref<1x3x256xf32, #tpu.memory_space<vmem>>, %arg4: memref<1x1x8x128xi32, #tpu.memory_space<vmem>>) attributes {dimension_semantics = [#tpu.dimension_semantics<parallel>, #tpu.dimension_semantics<parallel>], iteration_bounds = array<i64: 2, 2>, scalar_prefetch = 0 : i64, scratch_operands = 0 : i64, tpu.core_type = #tpu.core_type<tc>, window_params = [{transform_indices = @transform_0, window_bounds = array<i64: 4, 256>}, {transform_indices = @transform_1, window_bounds = array<i64: 1, 3, 256>}, {transform_indices = @transform_2, window_bounds = array<i64: 1, 1, 8, 128>}]} {
    %c0 = arith.constant 0 : index
    %c0_0 = arith.constant 0 : index
    %0 = vector.load %arg2[%c0, %c0_0] : memref<4x256xf32, #tpu.memory_space<vmem>>, vector<4x256xf32>
    %1 = tpu.iota {dimensions = array<i32: 1>} : vector<1x256xi32>
    %c256_i32 = arith.constant 256 : i32
    %2 = arith.muli %arg1, %c256_i32 : i32
    %3 = vector.broadcast %2 : i32 to vector<1x256xi32>
    %4 = arith.addi %1, %3 : vector<1x256xi32>
    %c384_i32 = arith.constant 384 : i32
    %5 = vector.broadcast %c384_i32 : i32 to vector<1x256xi32>
    %6 = arith.cmpi slt, %4, %5 : vector<1x256xi32>
    %7 = vector.extract_strided_slice %0 {offsets = [0, 0], sizes = [1, 256], strides = [1, 1]} : vector<4x256xf32> to vector<1x256xf32>
    %8 = arith.fptosi %7 : vector<1x256xf32> to vector<1x256xi32>
    %9 = vector.broadcast %arg0 : i32 to vector<1x256xi32>
    %10 = arith.cmpi eq, %8, %9 : vector<1x256xi32>
    %11 = arith.andi %10, %6 : vector<1x256xi1>
    %12 = vector.extract_strided_slice %0 {offsets = [1, 0], sizes = [3, 256], strides = [1, 1]} : vector<4x256xf32> to vector<3x256xf32>
    %13 = arith.extui %11 : vector<1x256xi1> to vector<1x256xi32>
    %14 = arith.sitofp %13 : vector<1x256xi32> to vector<1x256xf32>
    %15 = vector.broadcast %14 : vector<1x256xf32> to vector<3x256xf32>
    %16 = arith.mulf %12, %15 : vector<3x256xf32>
    %c0_1 = arith.constant 0 : index
    %c0_2 = arith.constant 0 : index
    %c0_3 = arith.constant 0 : index
    %17 = vector.load %arg3[%c0_1, %c0_2, %c0_3] : memref<1x3x256xf32, #tpu.memory_space<vmem>>, vector<1x3x256xf32>
    %18 = vector.shape_cast %17 : vector<1x3x256xf32> to vector<3x256xf32>
    %19 = vector.shape_cast %16 : vector<3x256xf32> to vector<1x3x256xf32>
    tpu.vector_store %arg3[%c0_1, %c0_2, %c0_3], %19 {strides = array<i32>} : memref<1x3x256xf32, #tpu.memory_space<vmem>>, vector<1x3x256xf32>,
    %20 = arith.extui %11 : vector<1x256xi1> to vector<1x256xi32>
    %21 = vector.shape_cast %20 : vector<1x256xi32> to vector<1x1x256xi32>
    %cst = arith.constant dense<0> : vector<1xi32>
    %22 = vector.multi_reduction <add>, %21, %cst [1, 2] : vector<1x1x256xi32> to vector<1xi32>
    %23 = vector.shape_cast %22 : vector<1xi32> to vector<1x1x1xi32>
    %24 = vector.extract %23[0, 0, 0] : i32 from vector<1x1x1xi32>
    %25 = vector.broadcast %24 : i32 to vector<1x1x8x128xi32>
    %c0_4 = arith.constant 0 : index
    %c0_5 = arith.constant 0 : index
    %c0_6 = arith.constant 0 : index
    %c0_7 = arith.constant 0 : index
    %26 = vector.load %arg4[%c0_4, %c0_5, %c0_6, %c0_7] : memref<1x1x8x128xi32, #tpu.memory_space<vmem>>, vector<1x1x8x128xi32>
    tpu.vector_store %arg4[%c0_4, %c0_5, %c0_6, %c0_7], %25 {strides = array<i32>} : memref<1x1x8x128xi32, #tpu.memory_space<vmem>>, vector<1x1x8x128xi32>,
    return
  }
  func.func @transform_0(%arg0: i32, %arg1: i32) -> (i32, i32) {
    %c0_i32 = arith.constant 0 : i32
    %c0_i32_0 = arith.constant 0 : i32
    return %c0_i32, %arg1 : i32, i32
  }
  func.func @transform_1(%arg0: i32, %arg1: i32) -> (i32, i32, i32) {
    %c0_i32 = arith.constant 0 : i32
    %c0_i32_0 = arith.constant 0 : i32
    return %arg0, %c0_i32, %arg1 : i32, i32, i32
  }
  func.func @transform_2(%arg0: i32, %arg1: i32) -> (i32, i32, i32, i32) {
    %c0_i32 = arith.constant 0 : i32
    %c0_i32_0 = arith.constant 0 : i32
    %c0_i32_1 = arith.constant 0 : i32
    return %arg0, %arg1, %c0_i32, %c0_i32_0 : i32, i32, i32, i32
  }
}

</mosaic_0001>

<bundles_post_ra>
// kernel: tpu_custom_call.1
= control target key start
LH: loop header
LB: loop body
LE: loop exit
PB: predicated region body
PF: predicated region fallthrough
CT: control target
= control target key end

     0   :  { %s2138_s0 = inlined_call_operand.hbm [shape: f32[4,384], index: 0, kind: input, shape index: {}]   ;;  %s2139_s1 = inlined_call_operand.vmem [shape: f32[2,3,384], index: 1, kind: output, shape index: {0}]   ;;  %s2140_s2 = inlined_call_operand.hbm [shape: s32[2,2,8,128], index: 2, kind: output, shape index: {1}]  }
   0x1   :  { %2150 = sst [smem:[#allocation16_spill]] %s2138_s0 }
   0x2   :  { %2151 = sst [smem:[#allocation17_spill]] %s2139_s1 }
   0x3   :  { %8 = vsyncpa [#allocation3], 0 }
   0x4   :  { %10 = vsyncpa [#allocation3 + $0x1], 0 }
   0x5   :  { %11 = vsyncpa [#allocation4], 0 }
   0x6   :  { %13 = vsyncpa [#allocation4 + $0x1], 0  ;;  %s1501_s9 = smov 0   ;;  %s1503_s10 = smov 0  }
   0x7   :  { %s1505_s11 = smov 0   ;;  %s1507_s12 = smov 0  }
   0x8   :  { %s1509_s13 = smov 0   ;;  %s1511_s14 = smov 0  }
   0x9   :  { %s1513_s15 = smov 0   ;;  %s1515_s16 = smov 0  }
   0xa   :  { %s1517_s17 = smov 0   ;;  %s1519_s18 = smov 0  }
   0xb   :  { %s1521_s19 = smov 0  }
   0xc LB: > { %2152 = sst [smem:[#allocation9_spill]] %s1390_s13  ;;  %s912_s20 = sadd.s32 4294967295, %s1414_s19   ;;  %s1414_s19 = sphi %s1521_s19, %s19_s19   ;;  %s1410_s18 = sphi %s1519_s18, %s2188_s18   ;;  %s1406_s17 = sphi %s1517_s17, %s2187_s17   ;;  %s1402_s16 = sphi %s1515_s16, %s2186_s16   ;;  %s1398_s15 = sphi %s1513_s15, %s2185_s15   ;;  %s1394_s14 = sphi %s1511_s14, %s2184_s14   ;;  %s1390_s13 = sphi %s1509_s13, %s2183_s13   ;;  %s1386_s12 = sphi %s1507_s12, %s2182_s12   ;;  %s1382_s11 = sphi %s1505_s11, %s2191_s11   ;;  %s1378_s10 = sphi %s1503_s10, %s2190_s10   ;;  %s1374_s9 = sphi %s1501_s9, %s2189_s9  }
   0xd   : > { %2153 = sst [smem:[#allocation10_spill]] %s1394_s14  ;;  %s913_s21 = sadd.s32 4294967294, %s1414_s19  }
   0xe   : > { %2154 = sst [smem:[#allocation11_spill]] %s1406_s17  ;;  %s28_s22 = sadd.s32 1, %s1406_s17 }
   0xf   : > { %2155 = sst [smem:[#allocation12_spill]] %s1410_s18  ;;  %s31_s23 = sadd.s32 1, %s1410_s18 }
  0x10   : > { %p29_p0 = scmp.ge.s32.totalorder %s28_s22, 2  ;;  %s38_s24 = sadd.s32 1, %s1394_s14 }
  0x11   : > { %p45_p1 = scmp.ne.s32.totalorder %s1394_s14, %s1390_s13  ;;  %p46_p2 = scmp.eq.s32.totalorder %s1414_s19, 0 }
  0x12   : > { %s2193_s22 = smov (%p29_p0, %s28_s22), 0  ;;  %s2195_s23 = smov (!%p29_p0, %s31_s23), %s1410_s18 }
  0x13   : > { %2156 = sst [smem:[#allocation13_spill]] %s2193_s22  ;;  %s35_s25 = ssub.s32 %s1406_s17, %s2193_s22 }
  0x14   : > { %p1567_p3 = por %p46_p2, %p45_p1  ;;  %p33_p4 = scmp.ge.s32.totalorder %s2195_s23, 2 }
  0x15   : > { %p36_p5 = scmp.eq.s32.totalorder %s35_s25, 0  ;;  %p51_p6 = scmp.ne.s32.totalorder %s1390_s13, %s1386_s12 }
  0x16   : > { %p52_p7 = scmp.eq.s32.totalorder %s912_s20, 0  ;;  %s2197_s23 = smov (%p33_p4, %s2195_s23), 0 }
  0x17   : > { %2158 = sst [smem:[#allocation14_spill]] %s2197_s23  ;;  %s61_s29 = ssub.s32 %s1410_s18, %s2197_s23 }
  0x18   : > { %s1575_s27 = scalar_select %p36_p5, %s1394_s14, %s38_s24  }
  0x19   : > { %p1577_p8 = por %p52_p7, %p51_p6  ;;  %s63_s30 = sor.u32 %s61_s29, %s35_s25 }
  0x1a   : > { %2159 = sst [smem:[#allocation15_spill]] %s1575_s27  ;;  %s66_s3 = sadd.s32 1, %s1382_s11 }
  0x1b   : > { %s2160_s28 = scalar_select %p1577_p8, 1, 0 }
  0x1c   : > { %p64_p9 = scmp.eq.s32.totalorder %s63_s30, 0  ;;  %p76_p10 = scmp.ne.s32.totalorder %s1382_s11, %s1378_s10 }
  0x1d   : > { %p77_p11 = scmp.eq.s32.totalorder %s912_s20, 3  ;;  %p110_p12 = scmp.ne.s32.totalorder %s1378_s10, %s1374_s9 }
  0x1e   : > { %s1589_s4 = scalar_select %p64_p9, %s1382_s11, %s66_s3  }
  0x1f   : > { %p1591_p13 = por %p77_p11, %p76_p10  ;;  %p111_p0 = scmp.eq.s32.totalorder %s913_s21, 3 }
  0x20   : > { %p915_p2 = scmp.ge.s32.totalorder %s1414_s19, 4 }
  0x21   : > { %s2161_s5 = scalar_select %p1591_p13, 1, 0 }
  0x22   : > { %p1595_p1 = por %p111_p0, %p110_p12  ;;  %127 = sbr.rel (%p915_p2) target bundleno = 80 (0x50), region = 16 }
  0x24   : > { %s2162_s6 = scalar_select %p1595_p1, 1, 0 }
  0x29   : > { %130 = sbr.rel (!%p1567_p3) target bundleno = 80 (0x50), region = 20  ;;  %s131_s7 = sand.u32 (%p1567_p3), 1, %s1394_s14  }
  0x2a   : > { %s917_s8 = sshll.u32 (%p1567_p3), %s1406_s17, 1  ;;  %s916_s12 = sshll.u32 (%p1567_p3), %s131_s7, 3 }
  0x2b   : > { %s137_s20 = ssub.s32 (%p1567_p3), 3, %s917_s8  ;;  %s1607_s25 = scalar_lea.sflag (%p1567_p3), [#allocation3], %s131_s7 }
  0x2c   : > { %p138_p4 = scmp.lt.s32.totalorder (%p1567_p3), %s137_s20, 2  ;;  %s135_s29 = scalar_lea.vmem (%p1567_p3), [#allocation2], %s916_s12 }
  0x30   : > { %s2199_s20 = smov (!%p138_p4, %s137_s20), 2 }
  0x31   : > { %s1604_s24 = sshll.u32 %s2199_s20, 6 }
  0x32   : > { %s142_s21 = ssub.s32 128, %s1604_s24 }
  0x33   : > { %143 = vsyncadd %s1607_s25, %s142_s21  ;;  %p919_p3 = scmp.ne.s32.totalorder %s1604_s24, 0  ;;  %s962_s26 = sshll.u32 %s1406_s17, 7 }
  0x34   : > { %s2163_s0 = sld [smem:[#allocation16_spill]]  ;;  %s149_s7 = sshll.u32 %s135_s29, 4  ;;  %s150_s7 = int_to_ptr.vmem [resolvable:$true] %s149_s7 }
  0x3a   : > { %s1615_s8 = scalar_lea.hbm %s2163_s0, %s962_s26  ;;  %s1204_s23 = scalar_lea.hbm %s2163_s0, 192 }
  0x3b   : > { %s1200_s20 = scalar_lea.hbm %s1615_s8, %s1604_s24  ;;  %p1205_p9 = scmp.lt.u32.totalorder %s1615_s8, %s2163_s0 }
  0x3c   : > { %p1201_p5 = scmp.ne.s32.totalorder %s1615_s8, %s1200_s20  ;;  %p1206_p10 = scmp.lt.u32.totalorder %s1204_s23, %s1200_s20 }
  0x3d   : > { %p1208_p12 = scmp.lt.u32.totalorder %s1200_s20, %s1615_s8 }
  0x3e   : > { %p1202_p6 = pnand %p1201_p5, %p919_p3  ;;  %p1207_p11 = por %p1206_p10, %p1205_p9 }
  0x40   : > { %p1203_p7 = pneg %p1202_p6  ;;  %p1209_p0 = por %p1208_p12, %p1207_p11 }
  0x42   : > { %p1210_p2 = pnand %p1209_p0, %p1203_p7 }
  0x44   : > { %1213 = shalt.err (!%p1210_p2)
}
  0x45   : > { %s1214_s29 = scalar_lea.vmem %s150_s7, %s1604_s24  ;;  %s1480_s26 = smov [#allocation2]  }
  0x46   : > { %p1215_p4 = scmp.ne.s32.totalorder %s150_s7, %s1214_s29  ;;  %s1218_s30 = sshll.u32 %s1480_s26, 4  ;;  %s1219_s30 = int_to_ptr.vmem [resolvable:$false] %s1218_s30 }
  0x47   : > { %s1220_s3 = scalar_lea.vmem %s1219_s30, 256  ;;  %p1221_p1 = scmp.lt.s32.totalorder %s150_s7, %s1219_s30 }
  0x48   : > { %p1216_p5 = pnand %p1215_p4, %p919_p3  ;;  %p1222_p13 = scmp.lt.s32.totalorder %s1220_s3, %s1214_s29 }
  0x4a   : > { %p1217_p6 = pneg %p1216_p5  ;;  %p1223_p8 = por %p1222_p13, %p1221_p1 }
  0x4c   : > { %p1224_p9 = pnand %p1223_p8, %p1217_p6 }
  0x4e   : > { %1227 = shalt.err (!%p1224_p9)
}
  0x4f   : > { %152 = dma.hbm_to_vmem [thread:$0]  (%p919_p3), %s1615_s8, %s1604_s24, %s150_s7, %s1607_s25  }
  0x50 PF: > { %p923_p7 = scmp.ge.s32.totalorder %s1414_s19, 1  ;;  %p154_p10 = scmp.lt.s32.totalorder %s1414_s19, 5 }
  0x52   : > { %p155_p11 = pnand %p923_p7, %p154_p10 }
  0x53   : > { %s160_s18 = sand.u32 (!%p155_p11), 1, %s1390_s13   ;;  %p2164_p8 = scmp.ne.s32.totalorder (!%p155_p11), %s2160_s28, 0 }
  0x54   : > { %158 = sbr.rel (%p155_p11) target bundleno = 521 (0x209), region = 24  ;;  %s924_s22 = sshll.u32 (!%p155_p11), %s160_s18, 3 }
  0x55   : > { %s161_s23 = scalar_lea.sflag (!%p155_p11), [#allocation3], %s160_s18  ;;  %s164_s20 = scalar_lea.vmem (!%p155_p11), [#allocation2], %s924_s22 }
  0x5b   : > { %1365 = dma.done.wait (%p2164_p8), %s161_s23, 128  }
  0x5c   : > { %1367 = vsyncadd (%p2164_p8), %s161_s23, 4294967168  ;;  %s179_s24 = sand.u32 1, %s1378_s10   ;;  %v200_v0 = vlaneseq  ;;  %s927_s25 = sshll.u32 %s1398_s15, 8  ;;  %v199_v6 = vld [vmem:[%s164_s20] sm:$0xff]  ;;  %v1481_v7 = vmov 0   ;;  %v210_v11 = vstv %s1402_s16  ;;  %v1482_v17 = vmov 0.0  }
  0x5d   : > { %v204_v1 = vstv %s927_s25  ;;  %v967_v10 = vtrunc.f32 %v199_v6  ;;  %vm257_vm5 = vcmask 1040384   ;;  %s1650_s28 = sshll.u32 %s179_s24, 3  ;;  %s1661_s21 = scalar_lea.sflag [#allocation4], %s179_s24 }
  0x5e   : > { %v201_v2 = vand.u32 127, %v200_v0  ;;  %v221_v9 = vshrl.u32 %v200_v0, 7  ;;  %s1653_s8 = scalar_lea.vmem [#allocation5], %s1650_s28   ;;  %s2146_s12 = scalar_lea.vmem [#allocation6], %s1650_s28 }
  0x5f   : > { %v968_v13 = vcvt.f32.s32 %v967_v10  ;;  %p2165_p13 = scmp.ne.s32.totalorder %s2161_s5, 0 }
  0x60   : > { %v202_v3 = vadd.s32 128, %v201_v2  ;;  %v205_v4 = vadd.s32 %v204_v1, %v201_v2  ;;  %v222_v15 = vsub.s32 0, %v221_v9  ;;  %v226_v16 = vsub.s32 4, %v221_v9  ;;  %s932_s29 = sshll.u32 (%p2165_p13), %s1398_s15, 1  ;;  %s971_s26 = smul.u32 (%p2165_p13), 3, %s1402_s16 }
  0x61   : > { %vm211_vm2 = vcmp.eq.s32.totalorder %v968_v13, %v210_v11  ;;  %s295_s30 = ssub.s32 (%p2165_p13), 3, %s932_s29  ;;  %s2166_s1 = sld [smem:[#allocation17_spill]] (%p2165_p13) }
  0x62   : > { %v206_v5 = vadd.s32 %v204_v1, %v202_v3  ;;  %vm207_vm0 = vcmp.lt.s32.totalorder %v205_v4, 384  ;;  %p296_p1 = scmp.lt.s32.totalorder (%p2165_p13), %s295_s30, 2  ;;  %s301_s3 = sadd.s32 (%p2165_p13), %s971_s26, %s932_s29 }
  0x63   : > { %v212_v8 = vsel %vm207_vm0, 1, %v1481_v7  ;;  %s935_s18 = sshll.u32 (%p2165_p13), %s301_s3, 2 }
  0x64   : > { %vm208_vm1 = vcmp.lt.s32.totalorder %v206_v5, 384 }
  0x65   : > { %v213_v12 = vsel %vm208_vm1, 1, %v1481_v7 }
  0x66   : > { %v214_v14 = vcombine.low %v212_v8, %v213_v12 }
  0x67   : > { %s1670_s20 = scalar_lea.vmem (%p2165_p13), %s2166_s1, %s935_s18  }
  0x68   : > { %vm215_vm3 = vcmp.ne.s32.totalorder %v214_v14, 0 }
  0x69   : > { %vm216_vm4 = vmand %vm211_vm2, %vm215_vm3 }
  0x6a   : > { %v928_v18 = vsel %vm216_vm4, 1.0, %v1482_v17  ;;  %v217_v19 = vsel %vm216_vm4, 1, %v1481_v7 }
  0x6b   : > { %v223_v20 = vrot.slane %v928_v18, %v222_v15  ;;  %v227_v21 = vrot.slane %v928_v18, %v226_v16  ;;  %v252_v22 = vrot.slane %v217_v19, %v222_v15  ;;  %v256_v23 = vrot.slane %v217_v19, %v226_v16 }
  0x6d   : > { %v233_v24 = vrot.slane %v223_v20, %v222_v15  ;;  %v237_v25 = vrot.slane %v227_v21, %v222_v15  ;;  %v258_v26 = vsel %vm257_vm5, %v252_v22, 0  ;;  %v259_v27 = vsel %vm257_vm5, %v256_v23, 0 }
  0x6e   : > { %v260_v28 = vadd.s32 %v259_v27, %v258_v26 }
  0x6f   : > { %v240_v29 = vcombine.low %v233_v24, %v237_v25 }
  0x70   : > { %v262_v30 = vshrl.u32 %v260_v28, 16  ;;  %v261_v31 = vand.u32 65535, %v260_v28 }
  0x71   : > { %v241_v32 = vrot.slane %v240_v29, 7 }
  0x72   : > { %v264_v33 = vcvt.s32.f32 %v262_v30  ;;  %v263_v35 = vcvt.s32.f32 %v261_v31 }
  0x73   : > { %v243_v34 = vmul.f32 %v241_v32, %v199_v6 }
  0x74   : > { %267 = vadd.xlane.f32.xlu0 %v264_v33 }
  0x75   : > { %v929_v36 = vrot.slane %v243_v34, 9 }
  0x77   : > { %248 = vst [vmem:[%s1653_s8] sm:$0x77] %v929_v36 }
  0x78   : > { %265 = vadd.xlane.f32.xlu0 %v263_v35 }
 0x101   : > { %v268_v37 = vpop.xlane.xlu0 %267 }
 0x102   : > { %v270_v38 = vcvt.f32.s32 %v268_v37 }
 0x104   : > { %v271_v40 = vshll.u32 %v270_v38, 16 }
 0x105   : > { %v266_v39 = vpop.xlane.xlu0 %265 }
 0x106   : > { %v269_v41 = vcvt.f32.s32 %v266_v39 }
 0x108   : > { %v272_v42 = vadd.s32 %v271_v40, %v269_v41 }
 0x10a   : > { %v273_v43 = vrot.slane %v272_v42, 4 }
 0x10c   : > { %v274_v44 = vadd.s32 %v273_v43, %v272_v42 }
 0x10e   : > { %v275_v45 = vrot.slane %v274_v44, 2 }
 0x110   : > { %v276_v46 = vadd.s32 %v275_v45, %v274_v44 }
 0x112   : > { %v277_v47 = vrot.slane %v276_v46, 1 }
 0x114   : > { %v278_v48 = vadd.s32 %v277_v47, %v276_v46 }
 0x116   : > { %969 = vpush %v278_v48 }
 0x143   : > { %293 = sbr.rel (!%p2165_p13) target bundleno = 495 (0x1ef), region = 32 }
 0x147   : > { %s970_s7 = spop %969 }
 0x148   : > { %v280_v49 = vstv %s970_s7 }
 0x149   : > { %281 = vst [vmem:[%s2146_s12] sm:$0xff] %v280_v49 }
 0x14a   : > { %s2201_s30 = smov (!%p296_p1, %s295_s30), 2 }
 0x14b   : > { %s933_s25 = sshll.u32 %s2201_s30, 6  ;;  %s1672_s24 = sshll.u32 %s2201_s30, 2 }
 0x14c   : > { %p937_p3 = scmp.eq.s32.totalorder %s933_s25, 0 }
 0x14d   : > { %p308_p12 = scmp.lt.u32.totalorder (!%p937_p3), %s1672_s24, 8 }
 0x14e   : > { %307 = sbr.rel (%p937_p3) target bundleno = 495 (0x1ef), region = 36 }
 0x155   : > { %311 = sbr.rel (%p308_p12) target bundleno = 486 (0x1e6), region = 40  ;;  %s1676_s7 = sand.u32 (!%p308_p12), 7, %s1672_s24  }
 0x156   : > { %p327_p0 = scmp.eq.s32.totalorder (!%p308_p12), %s1676_s7, 0  ;;  %p938_p2 = scmp.ne.s32.totalorder (!%p308_p12), %s1676_s7, 0 }
 0x15c   : > { %330 = sbr.rel (%p938_p2) target bundleno = 415 (0x19f), region = 55  ;;  %s331_s29 = sshrl.u32 (!%p938_p2), %s1672_s24, 3 }
 0x15d   : > { %s1683_s26 = sshrl.u32 (!%p938_p2), %s331_s29, 6 }
 0x15e   : > { %p939_p4 = scmp.le.s32.totalorder (!%p938_p2), %s1683_s26, 0 }
 0x163   : > { %817 = sbr.rel (%p939_p4) target bundleno = 395 (0x18b), region = 159  ;;  %s2167_s30 = smov (!%p939_p4), %s1670_s20 }
 0x164   : > { %s2168_s3 = smov (!%p939_p4), %s1653_s8  ;;  %s1692_s18 = smov (!%p939_p4), 0  }
 0x165   : > { %s1694_s22 = smov (!%p939_p4), 0  }
 0x16a LB: >> { %v344_v50 = vld [vmem:[%s1422_s3] sm:$0xff]  ;;  %v346_v51 = vld [vmem:[%s1422_s3 + $0x8] sm:$0xff]  ;;  %v348_v52 = vld [vmem:[%s1422_s3 + $0x10] sm:$0xff]  ;;  %s472_s23 = sadd.s32 1, %s1426_s18  ;;  %s338_s22 = sadd.s32 1, %s1430_s22   ;;  %s1430_s22 = sphi %s1694_s22, %s338_s22   ;;  %s1426_s18 = sphi %s1692_s18, %s2171_s18   ;;  %s1422_s3 = sphi %s2168_s3, %s2170_s3   ;;  %s1418_s30 = sphi %s2167_s30, %s2169_s30  }
 0x16b   : >> { %345 = vst [vmem:[%s1418_s30] sm:$0xff] %v344_v50  ;;  %347 = vst [vmem:[%s1418_s30 + $0x8] sm:$0xff] %v346_v51  ;;  %v350_v53 = vld [vmem:[%s1422_s3 + $0x18] sm:$0xff]  ;;  %v352_v54 = vld [vmem:[%s1422_s3 + $0x20] sm:$0xff]  ;;  %p473_p5 = scmp.ge.s32.totalorder %s472_s23, %s1683_s26  ;;  %p337_p6 = scmp.ge.s32.totalorder %s338_s22, %s1683_s26 }
 0x16c   : >> { %349 = vst [vmem:[%s1418_s30 + $0x10] sm:$0xff] %v348_v52  ;;  %v354_v55 = vld [vmem:[%s1422_s3 + $0x28] sm:$0xff]  ;;  %351 = vst [vmem:[%s1418_s30 + $0x18] sm:$0xff] %v350_v53  ;;  %v356_v56 = vld [vmem:[%s1422_s3 + $0x30] sm:$0xff] }
 0x16d   : >> { %353 = vst [vmem:[%s1418_s30 + $0x20] sm:$0xff] %v352_v54  ;;  %355 = vst [vmem:[%s1418_s30 + $0x28] sm:$0xff] %v354_v55  ;;  %v358_v57 = vld [vmem:[%s1422_s3 + $0x38] sm:$0xff]  ;;  %v360_v58 = vld [vmem:[%s1422_s3 + $0x40] sm:$0xff]  ;;  %s2203_s23 = smov (%p473_p5, %s472_s23), 0 }
 0x16e   : >> { %357 = vst [vmem:[%s1418_s30 + $0x30] sm:$0xff] %v356_v56  ;;  %359 = vst [vmem:[%s1418_s30 + $0x38] sm:$0xff] %v358_v57  ;;  %v362_v59 = vld [vmem:[%s1422_s3 + $0x48] sm:$0xff]  ;;  %v364_v60 = vld [vmem:[%s1422_s3 + $0x50] sm:$0xff]  ;;  %s940_s25 = sshll.u32 %s2203_s23, 9 }
 0x16f   : >> { %361 = vst [vmem:[%s1418_s30 + $0x40] sm:$0xff] %v360_v58  ;;  %v366_v61 = vld [vmem:[%s1422_s3 + $0x58] sm:$0xff]  ;;  %363 = vst [vmem:[%s1418_s30 + $0x48] sm:$0xff] %v362_v59  ;;  %v368_v62 = vld [vmem:[%s1422_s3 + $0x60] sm:$0xff]  ;;  %s1750_s18 = scalar_lea.vmem %s1653_s8, %s940_s25 [#allocation5]   ;;  %s1753_s12 = scalar_lea.vmem %s1670_s20, %s940_s25  }
 0x170   : >> { %365 = vst [vmem:[%s1418_s30 + $0x50] sm:$0xff] %v364_v60  ;;  %367 = vst [vmem:[%s1418_s30 + $0x58] sm:$0xff] %v366_v61  ;;  %v370_v63 = vld [vmem:[%s1422_s3 + $0x68] sm:$0xff]  ;;  %v372_v0 = vld [vmem:[%s1422_s3 + $0x70] sm:$0xff] }
 0x171   : >> { %369 = vst [vmem:[%s1418_s30 + $0x60] sm:$0xff] %v368_v62  ;;  %371 = vst [vmem:[%s1418_s30 + $0x68] sm:$0xff] %v370_v63  ;;  %v374_v1 = vld [vmem:[%s1422_s3 + $0x78] sm:$0xff]  ;;  %v376_v2 = vld [vmem:[%s1422_s3 + $0x80] sm:$0xff] }
 0x172   : >> { %373 = vst [vmem:[%s1418_s30 + $0x70] sm:$0xff] %v372_v0  ;;  %v378_v3 = vld [vmem:[%s1422_s3 + $0x88] sm:$0xff]  ;;  %375 = vst [vmem:[%s1418_s30 + $0x78] sm:$0xff] %v374_v1  ;;  %v380_v4 = vld [vmem:[%s1422_s3 + $0x90] sm:$0xff] }
 0x173   : >> { %377 = vst [vmem:[%s1418_s30 + $0x80] sm:$0xff] %v376_v2  ;;  %379 = vst [vmem:[%s1418_s30 + $0x88] sm:$0xff] %v378_v3  ;;  %v382_v5 = vld [vmem:[%s1422_s3 + $0x98] sm:$0xff]  ;;  %v384_v6 = vld [vmem:[%s1422_s3 + $0xa0] sm:$0xff] }
 0x174   : >> { %381 = vst [vmem:[%s1418_s30 + $0x90] sm:$0xff] %v380_v4  ;;  %383 = vst [vmem:[%s1418_s30 + $0x98] sm:$0xff] %v382_v5  ;;  %v386_v7 = vld [vmem:[%s1422_s3 + $0xa8] sm:$0xff]  ;;  %v388_v8 = vld [vmem:[%s1422_s3 + $0xb0] sm:$0xff] }
 0x175   : >> { %385 = vst [vmem:[%s1418_s30 + $0xa0] sm:$0xff] %v384_v6  ;;  %v390_v9 = vld [vmem:[%s1422_s3 + $0xb8] sm:$0xff]  ;;  %387 = vst [vmem:[%s1418_s30 + $0xa8] sm:$0xff] %v386_v7  ;;  %v392_v10 = vld [vmem:[%s1422_s3 + $0xc0] sm:$0xff] }
 0x176   : >> { %389 = vst [vmem:[%s1418_s30 + $0xb0] sm:$0xff] %v388_v8  ;;  %391 = vst [vmem:[%s1418_s30 + $0xb8] sm:$0xff] %v390_v9  ;;  %v394_v11 = vld [vmem:[%s1422_s3 + $0xc8] sm:$0xff]  ;;  %v396_v12 = vld [vmem:[%s1422_s3 + $0xd0] sm:$0xff] }
 0x177   : >> { %393 = vst [vmem:[%s1418_s30 + $0xc0] sm:$0xff] %v392_v10  ;;  %395 = vst [vmem:[%s1418_s30 + $0xc8] sm:$0xff] %v394_v11  ;;  %v398_v13 = vld [vmem:[%s1422_s3 + $0xd8] sm:$0xff]  ;;  %v400_v14 = vld [vmem:[%s1422_s3 + $0xe0] sm:$0xff] }
 0x178   : >> { %397 = vst [vmem:[%s1418_s30 + $0xd0] sm:$0xff] %v396_v12  ;;  %v402_v15 = vld [vmem:[%s1422_s3 + $0xe8] sm:$0xff]  ;;  %399 = vst [vmem:[%s1418_s30 + $0xd8] sm:$0xff] %v398_v13  ;;  %v404_v16 = vld [vmem:[%s1422_s3 + $0xf0] sm:$0xff] }
 0x179   : >> { %401 = vst [vmem:[%s1418_s30 + $0xe0] sm:$0xff] %v400_v14  ;;  %403 = vst [vmem:[%s1418_s30 + $0xe8] sm:$0xff] %v402_v15  ;;  %v406_v17 = vld [vmem:[%s1422_s3 + $0xf8] sm:$0xff]  ;;  %v408_v18 = vld [vmem:[%s1422_s3 + $0x100] sm:$0xff] }
 0x17a   : >> { %405 = vst [vmem:[%s1418_s30 + $0xf0] sm:$0xff] %v404_v16  ;;  %407 = vst [vmem:[%s1418_s30 + $0xf8] sm:$0xff] %v406_v17  ;;  %v410_v19 = vld [vmem:[%s1422_s3 + $0x108] sm:$0xff]  ;;  %v412_v20 = vld [vmem:[%s1422_s3 + $0x110] sm:$0xff] }
 0x17b   : >> { %409 = vst [vmem:[%s1418_s30 + $0x100] sm:$0xff] %v408_v18  ;;  %v414_v21 = vld [vmem:[%s1422_s3 + $0x118] sm:$0xff]  ;;  %411 = vst [vmem:[%s1418_s30 + $0x108] sm:$0xff] %v410_v19  ;;  %v416_v22 = vld [vmem:[%s1422_s3 + $0x120] sm:$0xff] }
 0x17c   : >> { %413 = vst [vmem:[%s1418_s30 + $0x110] sm:$0xff] %v412_v20  ;;  %415 = vst [vmem:[%s1418_s30 + $0x118] sm:$0xff] %v414_v21  ;;  %v418_v23 = vld [vmem:[%s1422_s3 + $0x128] sm:$0xff]  ;;  %v420_v24 = vld [vmem:[%s1422_s3 + $0x130] sm:$0xff] }
 0x17d   : >> { %417 = vst [vmem:[%s1418_s30 + $0x120] sm:$0xff] %v416_v22  ;;  %419 = vst [vmem:[%s1418_s30 + $0x128] sm:$0xff] %v418_v23  ;;  %v422_v25 = vld [vmem:[%s1422_s3 + $0x138] sm:$0xff]  ;;  %v424_v26 = vld [vmem:[%s1422_s3 + $0x140] sm:$0xff] }
 0x17e   : >> { %421 = vst [vmem:[%s1418_s30 + $0x130] sm:$0xff] %v420_v24  ;;  %v426_v27 = vld [vmem:[%s1422_s3 + $0x148] sm:$0xff]  ;;  %423 = vst [vmem:[%s1418_s30 + $0x138] sm:$0xff] %v422_v25  ;;  %v428_v28 = vld [vmem:[%s1422_s3 + $0x150] sm:$0xff] }
 0x17f   : >> { %425 = vst [vmem:[%s1418_s30 + $0x140] sm:$0xff] %v424_v26  ;;  %427 = vst [vmem:[%s1418_s30 + $0x148] sm:$0xff] %v426_v27  ;;  %v430_v29 = vld [vmem:[%s1422_s3 + $0x158] sm:$0xff]  ;;  %v432_v30 = vld [vmem:[%s1422_s3 + $0x160] sm:$0xff] }
 0x180   : >> { %429 = vst [vmem:[%s1418_s30 + $0x150] sm:$0xff] %v428_v28  ;;  %431 = vst [vmem:[%s1418_s30 + $0x158] sm:$0xff] %v430_v29  ;;  %v434_v31 = vld [vmem:[%s1422_s3 + $0x168] sm:$0xff]  ;;  %v436_v32 = vld [vmem:[%s1422_s3 + $0x170] sm:$0xff] }
 0x181   : >> { %433 = vst [vmem:[%s1418_s30 + $0x160] sm:$0xff] %v432_v30  ;;  %v438_v33 = vld [vmem:[%s1422_s3 + $0x178] sm:$0xff]  ;;  %435 = vst [vmem:[%s1418_s30 + $0x168] sm:$0xff] %v434_v31  ;;  %v440_v34 = vld [vmem:[%s1422_s3 + $0x180] sm:$0xff] }
 0x182   : >> { %437 = vst [vmem:[%s1418_s30 + $0x170] sm:$0xff] %v436_v32  ;;  %439 = vst [vmem:[%s1418_s30 + $0x178] sm:$0xff] %v438_v33  ;;  %v442_v35 = vld [vmem:[%s1422_s3 + $0x188] sm:$0xff]  ;;  %v444_v36 = vld [vmem:[%s1422_s3 + $0x190] sm:$0xff] }
 0x183   : >> { %441 = vst [vmem:[%s1418_s30 + $0x180] sm:$0xff] %v440_v34  ;;  %443 = vst [vmem:[%s1418_s30 + $0x188] sm:$0xff] %v442_v35  ;;  %v446_v37 = vld [vmem:[%s1422_s3 + $0x198] sm:$0xff]  ;;  %v448_v38 = vld [vmem:[%s1422_s3 + $0x1a0] sm:$0xff] }
 0x184   : >> { %445 = vst [vmem:[%s1418_s30 + $0x190] sm:$0xff] %v444_v36  ;;  %v450_v39 = vld [vmem:[%s1422_s3 + $0x1a8] sm:$0xff]  ;;  %447 = vst [vmem:[%s1418_s30 + $0x198] sm:$0xff] %v446_v37  ;;  %v452_v40 = vld [vmem:[%s1422_s3 + $0x1b0] sm:$0xff]  ;;  %340 = sbr.rel (!%p337_p6) target bundleno = 362 (0x16a), region = 165 }
 0x185   : >> { %449 = vst [vmem:[%s1418_s30 + $0x1a0] sm:$0xff] %v448_v38  ;;  %451 = vst [vmem:[%s1418_s30 + $0x1a8] sm:$0xff] %v450_v39  ;;  %v454_v41 = vld [vmem:[%s1422_s3 + $0x1b8] sm:$0xff]  ;;  %v456_v42 = vld [vmem:[%s1422_s3 + $0x1c0] sm:$0xff] }
 0x186   : >> { %453 = vst [vmem:[%s1418_s30 + $0x1b0] sm:$0xff] %v452_v40  ;;  %455 = vst [vmem:[%s1418_s30 + $0x1b8] sm:$0xff] %v454_v41  ;;  %v458_v43 = vld [vmem:[%s1422_s3 + $0x1c8] sm:$0xff]  ;;  %v460_v44 = vld [vmem:[%s1422_s3 + $0x1d0] sm:$0xff] }
 0x187   : >> { %457 = vst [vmem:[%s1418_s30 + $0x1c0] sm:$0xff] %v456_v42  ;;  %v462_v45 = vld [vmem:[%s1422_s3 + $0x1d8] sm:$0xff]  ;;  %459 = vst [vmem:[%s1418_s30 + $0x1c8] sm:$0xff] %v458_v43  ;;  %v464_v46 = vld [vmem:[%s1422_s3 + $0x1e0] sm:$0xff] }
 0x188   : >> { %461 = vst [vmem:[%s1418_s30 + $0x1d0] sm:$0xff] %v460_v44  ;;  %463 = vst [vmem:[%s1418_s30 + $0x1d8] sm:$0xff] %v462_v45  ;;  %v466_v47 = vld [vmem:[%s1422_s3 + $0x1e8] sm:$0xff]  ;;  %v468_v48 = vld [vmem:[%s1422_s3 + $0x1f0] sm:$0xff] }
 0x189   : >> { %465 = vst [vmem:[%s1418_s30 + $0x1e0] sm:$0xff] %v464_v46  ;;  %467 = vst [vmem:[%s1418_s30 + $0x1e8] sm:$0xff] %v466_v47  ;;  %v470_v49 = vld [vmem:[%s1422_s3 + $0x1f8] sm:$0xff]  ;;  %s2170_s3 = smov %s1750_s18  ;;  %s2171_s18 = smov %s2203_s23 }
 0x18a   : >> { %469 = vst [vmem:[%s1418_s30 + $0x1f0] sm:$0xff] %v468_v48  ;;  %471 = vst [vmem:[%s1418_s30 + $0x1f8] sm:$0xff] %v470_v49  ;;  %s2169_s30 = smov %s1753_s12 }
 0x18b PF: > { %s1859_s25 = sand.u32 63, %s331_s29   ;;  %s963_s0 = sshll.u32 %s1683_s26, 13 }
 0x18c   : > { %s483_s1 = sshra.s32 %s963_s0, 4  ;;  %p945_p9 = scmp.le.s32.totalorder %s1859_s25, 0 }
 0x18d   : > { %s484_s17 = scalar_lea.vmem %s1653_s8, %s483_s1 [#allocation5]   ;;  %s487_s27 = scalar_lea.vmem %s1670_s20, %s483_s1  }
 0x18e   : > { %831 = sbr.rel (%p945_p9) target bundleno = 415 (0x19f), region = 170  ;;  %s1432_s12 = smov (!%p945_p9), %s487_s27  }
 0x18f   : > { %s1436_s23 = smov (!%p945_p9), %s484_s17   ;;  %s1440_s14 = smov (!%p945_p9), 0  }
 0x190   : > { %s1444_s22 = smov (!%p945_p9), 0  }
 0x195 LB: >> { %v499_v50 = vld [vmem:[%s1438_s23] sm:$0xff]  ;;  %s501_s29 = sadd.s32 1, %s1442_s14  ;;  %s493_s22 = sadd.s32 1, %s1446_s22   ;;  %s1446_s22 = sphi %s1444_s22, %s493_s22   ;;  %s1442_s14 = sphi %s1440_s14, %s1441_s14   ;;  %s1438_s23 = sphi %s1436_s23, %s506_s23   ;;  %s1434_s12 = sphi %s1432_s12, %s507_s12  }
 0x196   : >> { %500 = vst [vmem:[%s1434_s12] sm:$0xff] %v499_v50  ;;  %p502_p7 = scmp.ge.s32.totalorder %s501_s29, %s1859_s25  ;;  %p492_p10 = scmp.ge.s32.totalorder %s493_s22, %s1859_s25 }
 0x198   : >> { %s2205_s29 = smov (%p502_p7, %s501_s29), 0  ;;  %495 = sbr.rel (!%p492_p10) target bundleno = 405 (0x195), region = 176 }
 0x199   : >> { %s946_s0 = sshll.u32 %s2205_s29, 3  ;;  %s1441_s14 = smov %s2205_s29  }
 0x19a   : >> { %s506_s23 = scalar_lea.vmem %s484_s17, %s946_s0 [#allocation5]   ;;  %s507_s12 = scalar_lea.vmem %s487_s27, %s946_s0  }
 0x19f PF: > { %510 = sbr.rel (%p327_p0) target bundleno = 486 (0x1e6), region = 73  ;;  %s1871_s1 = ssub.s32 (!%p327_p0), %s1672_s24, %s1676_s7 }
 0x1a0   : > { %s516_s14 = sshrl.u32 (!%p327_p0), %s1672_s24, 3 }
 0x1a1   : > { %s1880_s3 = sshrl.u32 (!%p327_p0), %s516_s14, 6 }
 0x1a2   : > { %p948_p11 = scmp.le.s32.totalorder (!%p327_p0), %s1880_s3, 0 }
 0x1a6   : > { %845 = sbr.rel (%p948_p11) target bundleno = 462 (0x1ce), region = 181  ;;  %s2172_s17 = smov (!%p948_p11), %s1670_s20 }
 0x1a7   : > { %s2173_s27 = smov (!%p948_p11), %s1653_s8  ;;  %s1889_s18 = smov (!%p948_p11), 0  }
 0x1a8   : > { %s1891_s25 = smov (!%p948_p11), 0  }
 0x1ad LB: >> { %v529_v51 = vld [vmem:[%s1454_s27] sm:$0xff]  ;;  %v531_v52 = vld [vmem:[%s1454_s27 + $0x8] sm:$0xff]  ;;  %v533_v53 = vld [vmem:[%s1454_s27 + $0x10] sm:$0xff]  ;;  %s657_s12 = sadd.s32 1, %s1458_s18  ;;  %s523_s25 = sadd.s32 1, %s1462_s25   ;;  %s1462_s25 = sphi %s1891_s25, %s523_s25   ;;  %s1458_s18 = sphi %s1889_s18, %s2176_s18   ;;  %s1454_s27 = sphi %s2173_s27, %s2175_s27   ;;  %s1450_s17 = sphi %s2172_s17, %s2174_s17  }
 0x1ae   : >> { %530 = vst [vmem:[%s1450_s17] sm:$0xff] %v529_v51  ;;  %532 = vst [vmem:[%s1450_s17 + $0x8] sm:$0xff] %v531_v52  ;;  %v535_v54 = vld [vmem:[%s1454_s27 + $0x18] sm:$0xff]  ;;  %v537_v55 = vld [vmem:[%s1454_s27 + $0x20] sm:$0xff]  ;;  %p658_p8 = scmp.ge.s32.totalorder %s657_s12, %s1880_s3  ;;  %p522_p13 = scmp.ge.s32.totalorder %s523_s25, %s1880_s3 }
 0x1af   : >> { %534 = vst [vmem:[%s1450_s17 + $0x10] sm:$0xff] %v533_v53  ;;  %v539_v56 = vld [vmem:[%s1454_s27 + $0x28] sm:$0xff]  ;;  %536 = vst [vmem:[%s1450_s17 + $0x18] sm:$0xff] %v535_v54  ;;  %v541_v57 = vld [vmem:[%s1454_s27 + $0x30] sm:$0xff] }
 0x1b0   : >> { %538 = vst [vmem:[%s1450_s17 + $0x20] sm:$0xff] %v537_v55  ;;  %540 = vst [vmem:[%s1450_s17 + $0x28] sm:$0xff] %v539_v56  ;;  %v543_v58 = vld [vmem:[%s1454_s27 + $0x38] sm:$0xff]  ;;  %v545_v59 = vld [vmem:[%s1454_s27 + $0x40] sm:$0xff]  ;;  %s2207_s12 = smov (%p658_p8, %s657_s12), 0 }
 0x1b1   : >> { %542 = vst [vmem:[%s1450_s17 + $0x30] sm:$0xff] %v541_v57  ;;  %544 = vst [vmem:[%s1450_s17 + $0x38] sm:$0xff] %v543_v58  ;;  %v547_v60 = vld [vmem:[%s1454_s27 + $0x48] sm:$0xff]  ;;  %v549_v61 = vld [vmem:[%s1454_s27 + $0x50] sm:$0xff]  ;;  %s949_s23 = sshll.u32 %s2207_s12, 9  ;;  %s2176_s18 = smov %s2207_s12 }
 0x1b2   : >> { %546 = vst [vmem:[%s1450_s17 + $0x40] sm:$0xff] %v545_v59  ;;  %v551_v62 = vld [vmem:[%s1454_s27 + $0x58] sm:$0xff]  ;;  %548 = vst [vmem:[%s1450_s17 + $0x48] sm:$0xff] %v547_v60  ;;  %v553_v63 = vld [vmem:[%s1454_s27 + $0x60] sm:$0xff]  ;;  %s1947_s22 = scalar_lea.vmem %s1653_s8, %s949_s23 [#allocation5]   ;;  %s1950_s29 = scalar_lea.vmem %s1670_s20, %s949_s23  }
 0x1b3   : >> { %550 = vst [vmem:[%s1450_s17 + $0x50] sm:$0xff] %v549_v61  ;;  %552 = vst [vmem:[%s1450_s17 + $0x58] sm:$0xff] %v551_v62  ;;  %v555_v0 = vld [vmem:[%s1454_s27 + $0x68] sm:$0xff]  ;;  %v557_v1 = vld [vmem:[%s1454_s27 + $0x70] sm:$0xff] }
 0x1b4   : >> { %554 = vst [vmem:[%s1450_s17 + $0x60] sm:$0xff] %v553_v63  ;;  %556 = vst [vmem:[%s1450_s17 + $0x68] sm:$0xff] %v555_v0  ;;  %v559_v2 = vld [vmem:[%s1454_s27 + $0x78] sm:$0xff]  ;;  %v561_v3 = vld [vmem:[%s1454_s27 + $0x80] sm:$0xff] }
 0x1b5   : >> { %558 = vst [vmem:[%s1450_s17 + $0x70] sm:$0xff] %v557_v1  ;;  %v563_v4 = vld [vmem:[%s1454_s27 + $0x88] sm:$0xff]  ;;  %560 = vst [vmem:[%s1450_s17 + $0x78] sm:$0xff] %v559_v2  ;;  %v565_v5 = vld [vmem:[%s1454_s27 + $0x90] sm:$0xff] }
 0x1b6   : >> { %562 = vst [vmem:[%s1450_s17 + $0x80] sm:$0xff] %v561_v3  ;;  %564 = vst [vmem:[%s1450_s17 + $0x88] sm:$0xff] %v563_v4  ;;  %v567_v6 = vld [vmem:[%s1454_s27 + $0x98] sm:$0xff]  ;;  %v569_v7 = vld [vmem:[%s1454_s27 + $0xa0] sm:$0xff] }
 0x1b7   : >> { %566 = vst [vmem:[%s1450_s17 + $0x90] sm:$0xff] %v565_v5  ;;  %568 = vst [vmem:[%s1450_s17 + $0x98] sm:$0xff] %v567_v6  ;;  %v571_v8 = vld [vmem:[%s1454_s27 + $0xa8] sm:$0xff]  ;;  %v573_v9 = vld [vmem:[%s1454_s27 + $0xb0] sm:$0xff] }
 0x1b8   : >> { %570 = vst [vmem:[%s1450_s17 + $0xa0] sm:$0xff] %v569_v7  ;;  %v575_v10 = vld [vmem:[%s1454_s27 + $0xb8] sm:$0xff]  ;;  %572 = vst [vmem:[%s1450_s17 + $0xa8] sm:$0xff] %v571_v8  ;;  %v577_v11 = vld [vmem:[%s1454_s27 + $0xc0] sm:$0xff] }
 0x1b9   : >> { %574 = vst [vmem:[%s1450_s17 + $0xb0] sm:$0xff] %v573_v9  ;;  %576 = vst [vmem:[%s1450_s17 + $0xb8] sm:$0xff] %v575_v10  ;;  %v579_v12 = vld [vmem:[%s1454_s27 + $0xc8] sm:$0xff]  ;;  %v581_v13 = vld [vmem:[%s1454_s27 + $0xd0] sm:$0xff] }
 0x1ba   : >> { %578 = vst [vmem:[%s1450_s17 + $0xc0] sm:$0xff] %v577_v11  ;;  %580 = vst [vmem:[%s1450_s17 + $0xc8] sm:$0xff] %v579_v12  ;;  %v583_v14 = vld [vmem:[%s1454_s27 + $0xd8] sm:$0xff]  ;;  %v585_v15 = vld [vmem:[%s1454_s27 + $0xe0] sm:$0xff] }
 0x1bb   : >> { %582 = vst [vmem:[%s1450_s17 + $0xd0] sm:$0xff] %v581_v13  ;;  %v587_v16 = vld [vmem:[%s1454_s27 + $0xe8] sm:$0xff]  ;;  %584 = vst [vmem:[%s1450_s17 + $0xd8] sm:$0xff] %v583_v14  ;;  %v589_v17 = vld [vmem:[%s1454_s27 + $0xf0] sm:$0xff] }
 0x1bc   : >> { %586 = vst [vmem:[%s1450_s17 + $0xe0] sm:$0xff] %v585_v15  ;;  %588 = vst [vmem:[%s1450_s17 + $0xe8] sm:$0xff] %v587_v16  ;;  %v591_v18 = vld [vmem:[%s1454_s27 + $0xf8] sm:$0xff]  ;;  %v593_v19 = vld [vmem:[%s1454_s27 + $0x100] sm:$0xff] }
 0x1bd   : >> { %590 = vst [vmem:[%s1450_s17 + $0xf0] sm:$0xff] %v589_v17  ;;  %592 = vst [vmem:[%s1450_s17 + $0xf8] sm:$0xff] %v591_v18  ;;  %v595_v20 = vld [vmem:[%s1454_s27 + $0x108] sm:$0xff]  ;;  %v597_v21 = vld [vmem:[%s1454_s27 + $0x110] sm:$0xff] }
 0x1be   : >> { %594 = vst [vmem:[%s1450_s17 + $0x100] sm:$0xff] %v593_v19  ;;  %v599_v22 = vld [vmem:[%s1454_s27 + $0x118] sm:$0xff]  ;;  %596 = vst [vmem:[%s1450_s17 + $0x108] sm:$0xff] %v595_v20  ;;  %v601_v23 = vld [vmem:[%s1454_s27 + $0x120] sm:$0xff] }
 0x1bf   : >> { %598 = vst [vmem:[%s1450_s17 + $0x110] sm:$0xff] %v597_v21  ;;  %600 = vst [vmem:[%s1450_s17 + $0x118] sm:$0xff] %v599_v22  ;;  %v603_v24 = vld [vmem:[%s1454_s27 + $0x128] sm:$0xff]  ;;  %v605_v25 = vld [vmem:[%s1454_s27 + $0x130] sm:$0xff] }
 0x1c0   : >> { %602 = vst [vmem:[%s1450_s17 + $0x120] sm:$0xff] %v601_v23  ;;  %604 = vst [vmem:[%s1450_s17 + $0x128] sm:$0xff] %v603_v24  ;;  %v607_v26 = vld [vmem:[%s1454_s27 + $0x138] sm:$0xff]  ;;  %v609_v27 = vld [vmem:[%s1454_s27 + $0x140] sm:$0xff] }
 0x1c1   : >> { %606 = vst [vmem:[%s1450_s17 + $0x130] sm:$0xff] %v605_v25  ;;  %v611_v28 = vld [vmem:[%s1454_s27 + $0x148] sm:$0xff]  ;;  %608 = vst [vmem:[%s1450_s17 + $0x138] sm:$0xff] %v607_v26  ;;  %v613_v29 = vld [vmem:[%s1454_s27 + $0x150] sm:$0xff] }
 0x1c2   : >> { %610 = vst [vmem:[%s1450_s17 + $0x140] sm:$0xff] %v609_v27  ;;  %612 = vst [vmem:[%s1450_s17 + $0x148] sm:$0xff] %v611_v28  ;;  %v615_v30 = vld [vmem:[%s1454_s27 + $0x158] sm:$0xff]  ;;  %v617_v31 = vld [vmem:[%s1454_s27 + $0x160] sm:$0xff] }
 0x1c3   : >> { %614 = vst [vmem:[%s1450_s17 + $0x150] sm:$0xff] %v613_v29  ;;  %616 = vst [vmem:[%s1450_s17 + $0x158] sm:$0xff] %v615_v30  ;;  %v619_v32 = vld [vmem:[%s1454_s27 + $0x168] sm:$0xff]  ;;  %v621_v33 = vld [vmem:[%s1454_s27 + $0x170] sm:$0xff] }
 0x1c4   : >> { %618 = vst [vmem:[%s1450_s17 + $0x160] sm:$0xff] %v617_v31  ;;  %v623_v34 = vld [vmem:[%s1454_s27 + $0x178] sm:$0xff]  ;;  %620 = vst [vmem:[%s1450_s17 + $0x168] sm:$0xff] %v619_v32  ;;  %v625_v35 = vld [vmem:[%s1454_s27 + $0x180] sm:$0xff] }
 0x1c5   : >> { %622 = vst [vmem:[%s1450_s17 + $0x170] sm:$0xff] %v621_v33  ;;  %624 = vst [vmem:[%s1450_s17 + $0x178] sm:$0xff] %v623_v34  ;;  %v627_v36 = vld [vmem:[%s1454_s27 + $0x188] sm:$0xff]  ;;  %v629_v37 = vld [vmem:[%s1454_s27 + $0x190] sm:$0xff] }
 0x1c6   : >> { %626 = vst [vmem:[%s1450_s17 + $0x180] sm:$0xff] %v625_v35  ;;  %628 = vst [vmem:[%s1450_s17 + $0x188] sm:$0xff] %v627_v36  ;;  %v631_v38 = vld [vmem:[%s1454_s27 + $0x198] sm:$0xff]  ;;  %v633_v39 = vld [vmem:[%s1454_s27 + $0x1a0] sm:$0xff] }
 0x1c7   : >> { %630 = vst [vmem:[%s1450_s17 + $0x190] sm:$0xff] %v629_v37  ;;  %v635_v40 = vld [vmem:[%s1454_s27 + $0x1a8] sm:$0xff]  ;;  %632 = vst [vmem:[%s1450_s17 + $0x198] sm:$0xff] %v631_v38  ;;  %v637_v41 = vld [vmem:[%s1454_s27 + $0x1b0] sm:$0xff]  ;;  %525 = sbr.rel (!%p522_p13) target bundleno = 429 (0x1ad), region = 187 }
 0x1c8   : >> { %634 = vst [vmem:[%s1450_s17 + $0x1a0] sm:$0xff] %v633_v39  ;;  %636 = vst [vmem:[%s1450_s17 + $0x1a8] sm:$0xff] %v635_v40  ;;  %v639_v42 = vld [vmem:[%s1454_s27 + $0x1b8] sm:$0xff]  ;;  %v641_v43 = vld [vmem:[%s1454_s27 + $0x1c0] sm:$0xff] }
 0x1c9   : >> { %638 = vst [vmem:[%s1450_s17 + $0x1b0] sm:$0xff] %v637_v41  ;;  %640 = vst [vmem:[%s1450_s17 + $0x1b8] sm:$0xff] %v639_v42  ;;  %v643_v44 = vld [vmem:[%s1454_s27 + $0x1c8] sm:$0xff]  ;;  %v645_v45 = vld [vmem:[%s1454_s27 + $0x1d0] sm:$0xff] }
 0x1ca   : >> { %642 = vst [vmem:[%s1450_s17 + $0x1c0] sm:$0xff] %v641_v43  ;;  %v647_v46 = vld [vmem:[%s1454_s27 + $0x1d8] sm:$0xff]  ;;  %644 = vst [vmem:[%s1450_s17 + $0x1c8] sm:$0xff] %v643_v44  ;;  %v649_v47 = vld [vmem:[%s1454_s27 + $0x1e0] sm:$0xff] }
 0x1cb   : >> { %646 = vst [vmem:[%s1450_s17 + $0x1d0] sm:$0xff] %v645_v45  ;;  %648 = vst [vmem:[%s1450_s17 + $0x1d8] sm:$0xff] %v647_v46  ;;  %v651_v48 = vld [vmem:[%s1454_s27 + $0x1e8] sm:$0xff]  ;;  %v653_v49 = vld [vmem:[%s1454_s27 + $0x1f0] sm:$0xff] }
 0x1cc   : >> { %650 = vst [vmem:[%s1450_s17 + $0x1e0] sm:$0xff] %v649_v47  ;;  %652 = vst [vmem:[%s1450_s17 + $0x1e8] sm:$0xff] %v651_v48  ;;  %v655_v50 = vld [vmem:[%s1454_s27 + $0x1f8] sm:$0xff]  ;;  %s2175_s27 = smov %s1947_s22 }
 0x1cd   : >> { %654 = vst [vmem:[%s1450_s17 + $0x1f0] sm:$0xff] %v653_v49  ;;  %656 = vst [vmem:[%s1450_s17 + $0x1f8] sm:$0xff] %v655_v50  ;;  %s2174_s17 = smov %s1950_s29 }
 0x1ce PF: > { %s2056_s0 = sand.u32 63, %s516_s14   ;;  %s965_s23 = sshll.u32 %s1880_s3, 13 }
 0x1cf   : > { %s668_s30 = sshra.s32 %s965_s23, 4  ;;  %p954_p1 = scmp.le.s32.totalorder %s2056_s0, 0 }
 0x1d0   : > { %s669_s26 = scalar_lea.vmem %s1653_s8, %s668_s30 [#allocation5]   ;;  %s672_s13 = scalar_lea.vmem %s1670_s20, %s668_s30  }
 0x1d1   : > { %859 = sbr.rel (%p954_p1) target bundleno = 482 (0x1e2), region = 192  ;;  %s1464_s22 = smov (!%p954_p1), %s672_s13  }
 0x1d2   : > { %s1468_s12 = smov (!%p954_p1), %s669_s26   ;;  %s1472_s29 = smov (!%p954_p1), 0  }
 0x1d3   : > { %s1476_s25 = smov (!%p954_p1), 0  }
 0x1d8 LB: >> { %v684_v51 = vld [vmem:[%s1470_s12] sm:$0xff]  ;;  %s686_s14 = sadd.s32 1, %s1474_s29  ;;  %s678_s25 = sadd.s32 1, %s1478_s25   ;;  %s1478_s25 = sphi %s1476_s25, %s678_s25   ;;  %s1474_s29 = sphi %s1472_s29, %s1473_s29   ;;  %s1470_s12 = sphi %s1468_s12, %s691_s12   ;;  %s1466_s22 = sphi %s1464_s22, %s692_s22  }
 0x1d9   : >> { %685 = vst [vmem:[%s1466_s22] sm:$0xff] %v684_v51  ;;  %p687_p3 = scmp.ge.s32.totalorder %s686_s14, %s2056_s0  ;;  %p677_p12 = scmp.ge.s32.totalorder %s678_s25, %s2056_s0 }
 0x1db   : >> { %s2209_s14 = smov (%p687_p3, %s686_s14), 0  ;;  %680 = sbr.rel (!%p677_p12) target bundleno = 472 (0x1d8), region = 198 }
 0x1dc   : >> { %s955_s30 = sshll.u32 %s2209_s14, 3  ;;  %s1473_s29 = smov %s2209_s14  }
 0x1dd   : >> { %s691_s12 = scalar_lea.vmem %s669_s26, %s955_s30 [#allocation5]   ;;  %s692_s22 = scalar_lea.vmem %s672_s13, %s955_s30  }
 0x1e2 PF: > { %s1483_s3 = smov 0   ;;  %s2177_s27 = scalar_lea.vmem %s1653_s8, %s1871_s1 [#allocation5] }
 0x1e3   : > { %s693_s17 = sshllo.u32 %s1483_s3, %s1676_s7  ;;  %s2178_s18 = scalar_lea.vmem %s1670_s20, %s1871_s1 }
 0x1e4   : > { %v702_v52 = vld [vmem:[%s2177_s27] sm:%s693_s17] }
 0x1e5   : > { %703 = vst [vmem:[%s2178_s18] sm:%s693_s17] %v702_v52 }
 0x1e6 PF: > { %p957_p0 = scmp.ge.u32.totalorder %s1672_s24, 8 }
 0x1e7   : > { %s1484_s23 = smov (!%p957_p0), 0  }
 0x1e8   : > { %314 = sbr.rel (%p957_p0) target bundleno = 495 (0x1ef), region = 44  ;;  %s315_s13 = sshllo.u32 (!%p957_p0), %s1484_s23, %s1672_s24 }
 0x1e9   : > { %v324_v53 = vld [vmem:[%s1653_s8] sm:%s315_s13] (!%p957_p0) }
 0x1ea   : > { %325 = vst [vmem:[%s1670_s20] sm:%s315_s13] (!%p957_p0), %v324_v53 }
 0x1ef PF: > { %s958_s7 = sshll.u32 %s1402_s16, 1  ;;  %s2179_s1 = scalar_lea.vmem [#allocation6], %s1650_s28 }
 0x1f0   : > { %s716_s26 = sshll.u32 %s2179_s1, 4  ;;  %s712_s0 = sadd.s32 %s1398_s15, %s958_s7  ;;  %s2079_s26 = int_to_ptr.vmem [resolvable:$true] %s716_s26 }
 0x1f1   : > { %s959_s22 = sshll.u32 %s712_s0, 7  ;;  %s1228_s12 = scalar_lea.vmem %s2079_s26, 128 }
 0x1f2   : > { %s714_s20 = scalar_lea.hbm %s2140_s2, %s959_s22  ;;  %p1229_p2 = scmp.ne.s32.totalorder %s2079_s26, %s1228_s12 }
 0x1f3   : > { %p2180_p4 = scmp.ne.s32.totalorder %s2161_s5, 0  ;;  %s1485_s29 = smov [#allocation6]  }
 0x1f4   : > { %s1232_s16 = sshll.u32 %s1485_s29, 4  ;;  %s1233_s16 = int_to_ptr.vmem [resolvable:$false] %s1232_s16 }
 0x1f5   : > { %p1230_p5 = pnand %p1229_p2, %p2180_p4  ;;  %s1234_s28 = scalar_lea.vmem %s1233_s16, 256 }
 0x1f6   : > { %p1235_p9 = scmp.lt.s32.totalorder %s2079_s26, %s1233_s16  ;;  %p1236_p7 = scmp.lt.s32.totalorder %s1234_s28, %s1228_s12 }
 0x1f7   : > { %p1231_p6 = pneg %p1230_p5 }
 0x1f8   : > { %p1237_p10 = por %p1236_p7, %p1235_p9 }
 0x1fa   : > { %p1238_p11 = pnand %p1237_p10, %p1231_p6 }
 0x1fc   : > { %1241 = shalt.err (!%p1238_p11)
}
 0x1fd   : > { %s1242_s15 = scalar_lea.hbm %s714_s20, 128  ;;  %s1246_s30 = scalar_lea.hbm %s2140_s2, 512 }
 0x1fe   : > { %p1243_p8 = scmp.ne.s32.totalorder %s714_s20, %s1242_s15  ;;  %p1247_p3 = scmp.lt.u32.totalorder %s714_s20, %s2140_s2 }
 0x1ff   : > { %p1248_p12 = scmp.lt.u32.totalorder %s1246_s30, %s1242_s15  ;;  %p1250_p2 = scmp.lt.u32.totalorder %s1242_s15, %s714_s20 }
 0x200   : > { %p1244_p13 = pnand %p1243_p8, %p2180_p4 }
 0x201   : > { %p1249_p0 = por %p1248_p12, %p1247_p3 }
 0x202   : > { %p1245_p1 = pneg %p1244_p13 }
 0x203   : > { %p1251_p5 = por %p1250_p2, %p1249_p0 }
 0x205   : > { %p1252_p6 = pnand %p1251_p5, %p1245_p1 }
 0x207   : > { %1255 = shalt.err (!%p1252_p6)
}
 0x208   : > { %973 = dma.vmem_to_hbm [thread:$0]  (%p2180_p4), %s2079_s26, 128, %s714_s20, %s1661_s21  }
 0x209 PF: > { %p979_p9 = scmp.ge.s32.totalorder %s1414_s19, 2  ;;  %s735_s27 = sand.u32 1, %s1374_s9  }
 0x20a   : > { %p2181_p7 = scmp.ne.s32.totalorder %s2162_s6, 0  ;;  %s736_s18 = scalar_lea.sflag [#allocation4], %s735_s27 }
 0x20c   : > { %p976_p10 = pnand %p979_p9, %p2181_p7 }
 0x20e   : > { %1369 = dma.done.wait (!%p976_p10), %s736_s18, 128  }
 0x20f   : > { %1371 = vsyncadd (!%p976_p10), %s736_s18, 4294967168  ;;  %s19_s19 = sadd.s32 1, %s1414_s19   ;;  %s2182_s12 = sld [smem:[#allocation9_spill]] }
 0x210   : > { %p16_p11 = scmp.ge.s32.totalorder %s19_s19, 6   ;;  %s2183_s13 = sld [smem:[#allocation10_spill]] }
 0x211   : > { %s2184_s14 = sld [smem:[#allocation15_spill]]  ;;  %s2185_s15 = sld [smem:[#allocation11_spill]] }
 0x212   : > { %s2186_s16 = sld [smem:[#allocation12_spill]]  ;;  %s2187_s17 = sld [smem:[#allocation13_spill]] }
 0x213   : > { %s2188_s18 = sld [smem:[#allocation14_spill]]  ;;  %s2189_s9 = smov %s1378_s10 }
 0x214   : > { %s2190_s10 = smov %s1382_s11  ;;  %s2191_s11 = smov %s1589_s4 }
 0x215   :  { %18 = sbr.rel (!%p16_p11) target bundleno = 12 (0xc), region = 209 }
 0x21c   :  { %741 = vsyncpa [#allocation3], 1 }
 0x21d   :  { %743 = vsyncpa [#allocation3 + $0x1], 1 }
 0x21e   :  { %744 = vsyncpa [#allocation4], 1 }
 0x21f   :  { %746 = vsyncpa [#allocation4 + $0x1], 1 }

</bundles_post_ra>
